<compile_context>
chip_gen: v7x
topology: tpu7x:2x2x1
jax: 0.10.0
libtpu: 0.0.40
codegen_flags: <defaults>
</compile_context>

<pallas_src>
import jax
import jax.numpy as jnp
from jax.experimental import pallas as pl
from jax.experimental.pallas import tpu as pltpu

BN_EPS = 1e-5


def _bn_elu(y, params_ref):
    """Training-mode BatchNorm1d (+affine) followed by ELU(alpha=1)."""
    gamma = params_ref[1:2, :]                      # (1, F)
    beta = params_ref[2:3, :]                       # (1, F)
    mean = jnp.mean(y, axis=0, keepdims=True)       # (1, F)  batch mean
    d = y - mean
    var = jnp.mean(d * d, axis=0, keepdims=True)    # biased batch variance
    s = gamma * jax.lax.rsqrt(var + BN_EPS)         # folded scale (EUP rsqrt)
    yn = d * s + beta                               # one mul + one add / elem
    # ELU(alpha=1): x if x > 0 else exp(x) - 1  (clamp arg so exp never blows up)
    return jnp.where(yn > 0.0, yn, jnp.exp(jnp.minimum(yn, 0.0)) - 1.0)


def mlp_kernel(x_ref, w1_ref, p1_ref, w2_ref, p2_ref, o_ref):
    x = x_ref[...]                                                   # (B, IN)

    # ---- L1 + bn1 + ELU ---------------------------------------------------
    # Note: the Linear bias is mathematically cancelled by the BN mean
    # subtraction; it is kept for exact module fidelity (cost is negligible).
    y = jnp.dot(x, w1_ref[...], preferred_element_type=jnp.float32)  # (B, H)
    y = y + p1_ref[0:1, :]
    y = _bn_elu(y, p1_ref)

    # ---- L2 + bn2 + ELU ---------------------------------------------------
    y = jnp.dot(y, w2_ref[...], preferred_element_type=jnp.float32)  # (B, O)
    y = y + p2_ref[0:1, :]
    y = _bn_elu(y, p2_ref)

    o_ref[...] = y.astype(o_ref.dtype)


def mlp_forward(x, w1, b1, g1, bt1, w2, b2, g2, bt2):
    """Pallas implementation of MLP.forward (training-mode BatchNorm).

    w1: (hid, in), w2: (out, hid) in PyTorch nn.Linear layout.
    """
    x = jnp.asarray(x, jnp.float32)
    B = x.shape[0]
    out_dim = w2.shape[0]

    # lane-dense weight layouts for the MXU
    w1t = jnp.asarray(w1, jnp.float32).T            # (in, hid)
    w2t = jnp.asarray(w2, jnp.float32).T            # (hid, out)

    # pack bias / gamma / beta per layer into one slab -> fewer DMA descriptors
    p1 = jnp.stack([b1, g1, bt1]).astype(jnp.float32)   # (3, hid)
    p2 = jnp.stack([b2, g2, bt2]).astype(jnp.float32)   # (3, out)

    return pl.pallas_call(
        mlp_kernel,
        out_shape=jax.ShapeDtypeStruct((B, out_dim), jnp.float32),
        in_specs=[pl.BlockSpec(memory_space=pltpu.MemorySpace.VMEM)] * 5,
        out_specs=pl.BlockSpec(memory_space=pltpu.MemorySpace.VMEM),
    )(x, w1t, p1, w2t, p2)


def mlp_ref(x, w1, b1, g1, bt1, w2, b2, g2, bt2):
    """Pure-JAX reference mirroring the PyTorch forward (train-mode BN)."""
    def bn_elu(y, g, bt):
        m = jnp.mean(y, axis=0, keepdims=True)
        v = jnp.mean((y - m) ** 2, axis=0, keepdims=True)
        yn = (y - m) / jnp.sqrt(v + BN_EPS) * g + bt
        return jnp.where(yn > 0.0, yn, jnp.exp(jnp.minimum(yn, 0.0)) - 1.0)

    y = x @ w1.T + b1
    y = bn_elu(y, g1, bt1)
    y = y @ w2.T + b2
    y = bn_elu(y, g2, bt2)
    return y


if __name__ == "__main__":
    # small shapes: batch=16, input_dim=64, hid_dim=128, out_dim=32
    B, IN, HID, OUT = 16, 64, 128, 32
    key = jax.random.PRNGKey(0)
    ks = jax.random.split(key, 9)

    x = jax.random.normal(ks[0], (B, IN), jnp.float32)
    w1 = jax.random.normal(ks[1], (HID, IN), jnp.float32) * (1.0 / IN ** 0.5)
    b1 = jax.random.normal(ks[2], (HID,), jnp.float32) * 0.1
    g1 = 1.0 + 0.1 * jax.random.normal(ks[3], (HID,), jnp.float32)
    bt1 = jax.random.normal(ks[4], (HID,), jnp.float32) * 0.1
    w2 = jax.random.normal(ks[5], (OUT, HID), jnp.float32) * (1.0 / HID ** 0.5)
    b2 = jax.random.normal(ks[6], (OUT,), jnp.float32) * 0.1
    g2 = 1.0 + 0.1 * jax.random.normal(ks[7], (OUT,), jnp.float32)
    bt2 = jax.random.normal(ks[8], (OUT,), jnp.float32) * 0.1

    out = mlp_forward(x, w1, b1, g1, bt1, w2, b2, g2, bt2)
    out = jax.block_until_ready(out)

    ref = mlp_ref(x, w1, b1, g1, bt1, w2, b2, g2, bt2)
    if not jnp.allclose(out, ref, rtol=1e-2, atol=1e-2):
        err = float(jnp.max(jnp.abs(out - ref)))
        raise AssertionError(f"mismatch: max|diff|={err}")

    # TODO(synk): BatchNorm1d running_mean/running_var buffer updates (a torch
    # train-mode side effect, not part of the returned tensor) are not emitted.
    print("KERNEL_OK")
</pallas_src>

<mosaic_0001>
module attributes {stable_mosaic.version = 11 : i64} {
  func.func @mlp_kernel(%arg0: memref<16x64xf32, #tpu.memory_space<vmem>>, %arg1: memref<64x128xf32, #tpu.memory_space<vmem>>, %arg2: memref<3x128xf32, #tpu.memory_space<vmem>>, %arg3: memref<128x32xf32, #tpu.memory_space<vmem>>, %arg4: memref<3x32xf32, #tpu.memory_space<vmem>>, %arg5: memref<16x32xf32, #tpu.memory_space<vmem>>) attributes {dimension_semantics = [], scalar_prefetch = 0 : i64, scratch_operands = 0 : i64, tpu.core_type = #tpu.core_type<tc>} {
    %c0 = arith.constant 0 : index
    %c0_0 = arith.constant 0 : index
    %0 = vector.load %arg0[%c0, %c0_0] : memref<16x64xf32, #tpu.memory_space<vmem>>, vector<16x64xf32>
    %c0_1 = arith.constant 0 : index
    %c0_2 = arith.constant 0 : index
    %1 = vector.load %arg1[%c0_1, %c0_2] : memref<64x128xf32, #tpu.memory_space<vmem>>, vector<64x128xf32>
    %cst = arith.constant dense<0.000000e+00> : vector<16x128xf32>
    %2 = tpu.matmul %0, %1, %cst {dimension_numbers = #tpu.dot_dimension_numbers<[1], [0], [0], [1], [0, 0, 1, 1], [], []>} : vector<16x64xf32>, vector<64x128xf32>, vector<16x128xf32> -> vector<16x128xf32>
    %c0_3 = arith.constant 0 : index
    %c0_4 = arith.constant 0 : index
    %3 = vector.load %arg2[%c0_3, %c0_4] : memref<3x128xf32, #tpu.memory_space<vmem>>, vector<1x128xf32>
    %4 = vector.broadcast %3 : vector<1x128xf32> to vector<16x128xf32>
    %5 = arith.addf %2, %4 : vector<16x128xf32>
    %c1 = arith.constant 1 : index
    %c0_5 = arith.constant 0 : index
    %6 = vector.load %arg2[%c1, %c0_5] : memref<3x128xf32, #tpu.memory_space<vmem>>, vector<1x128xf32>
    %c2 = arith.constant 2 : index
    %c0_6 = arith.constant 0 : index
    %7 = vector.load %arg2[%c2, %c0_6] : memref<3x128xf32, #tpu.memory_space<vmem>>, vector<1x128xf32>
    %cst_7 = arith.constant dense<0.000000e+00> : vector<128xf32>
    %8 = vector.multi_reduction <add>, %5, %cst_7 [0] : vector<16x128xf32> to vector<128xf32>
    %9 = vector.shape_cast %8 : vector<128xf32> to vector<1x128xf32>
    %cst_8 = arith.constant 1.600000e+01 : f32
    %10 = vector.broadcast %cst_8 : f32 to vector<1x128xf32>
    %11 = arith.divf %9, %10 : vector<1x128xf32>
    %12 = vector.broadcast %11 : vector<1x128xf32> to vector<16x128xf32>
    %13 = arith.subf %5, %12 : vector<16x128xf32>
    %14 = arith.mulf %13, %13 : vector<16x128xf32>
    %cst_9 = arith.constant dense<0.000000e+00> : vector<128xf32>
    %15 = vector.multi_reduction <add>, %14, %cst_9 [0] : vector<16x128xf32> to vector<128xf32>
    %16 = vector.shape_cast %15 : vector<128xf32> to vector<1x128xf32>
    %cst_10 = arith.constant 1.600000e+01 : f32
    %17 = vector.broadcast %cst_10 : f32 to vector<1x128xf32>
    %18 = arith.divf %16, %17 : vector<1x128xf32>
    %cst_11 = arith.constant 9.99999974E-6 : f32
    %19 = vector.broadcast %cst_11 : f32 to vector<1x128xf32>
    %20 = arith.addf %18, %19 : vector<1x128xf32>
    %21 = math.rsqrt %20 : vector<1x128xf32>
    %22 = arith.mulf %6, %21 : vector<1x128xf32>
    %23 = vector.broadcast %22 : vector<1x128xf32> to vector<16x128xf32>
    %24 = arith.mulf %13, %23 : vector<16x128xf32>
    %25 = vector.broadcast %7 : vector<1x128xf32> to vector<16x128xf32>
    %26 = arith.addf %24, %25 : vector<16x128xf32>
    %cst_12 = arith.constant 0.000000e+00 : f32
    %27 = vector.broadcast %cst_12 : f32 to vector<16x128xf32>
    %28 = arith.cmpf ogt, %26, %27 : vector<16x128xf32>
    %cst_13 = arith.constant 0.000000e+00 : f32
    %29 = vector.broadcast %cst_13 : f32 to vector<16x128xf32>
    %30 = arith.minimumf %26, %29 : vector<16x128xf32>
    %31 = math.exp %30 : vector<16x128xf32>
    %cst_14 = arith.constant 1.000000e+00 : f32
    %32 = vector.broadcast %cst_14 : f32 to vector<16x128xf32>
    %33 = arith.subf %31, %32 : vector<16x128xf32>
    %34 = arith.select %28, %26, %33 : vector<16x128xi1>, vector<16x128xf32>
    %c0_15 = arith.constant 0 : index
    %c0_16 = arith.constant 0 : index
    %35 = vector.load %arg3[%c0_15, %c0_16] : memref<128x32xf32, #tpu.memory_space<vmem>>, vector<128x32xf32>
    %cst_17 = arith.constant dense<0.000000e+00> : vector<16x32xf32>
    %36 = tpu.matmul %34, %35, %cst_17 {dimension_numbers = #tpu.dot_dimension_numbers<[1], [0], [0], [1], [0, 0, 1, 1], [], []>} : vector<16x128xf32>, vector<128x32xf32>, vector<16x32xf32> -> vector<16x32xf32>
    %c0_18 = arith.constant 0 : index
    %c0_19 = arith.constant 0 : index
    %37 = vector.load %arg4[%c0_18, %c0_19] : memref<3x32xf32, #tpu.memory_space<vmem>>, vector<1x32xf32>
    %38 = vector.broadcast %37 : vector<1x32xf32> to vector<16x32xf32>
    %39 = arith.addf %36, %38 : vector<16x32xf32>
    %c1_20 = arith.constant 1 : index
    %c0_21 = arith.constant 0 : index
    %40 = vector.load %arg4[%c1_20, %c0_21] : memref<3x32xf32, #tpu.memory_space<vmem>>, vector<1x32xf32>
    %c2_22 = arith.constant 2 : index
    %c0_23 = arith.constant 0 : index
    %41 = vector.load %arg4[%c2_22, %c0_23] : memref<3x32xf32, #tpu.memory_space<vmem>>, vector<1x32xf32>
    %cst_24 = arith.constant dense<0.000000e+00> : vector<32xf32>
    %42 = vector.multi_reduction <add>, %39, %cst_24 [0] : vector<16x32xf32> to vector<32xf32>
    %43 = vector.shape_cast %42 : vector<32xf32> to vector<1x32xf32>
    %cst_25 = arith.constant 1.600000e+01 : f32
    %44 = vector.broadcast %cst_25 : f32 to vector<1x32xf32>
    %45 = arith.divf %43, %44 : vector<1x32xf32>
    %46 = vector.broadcast %45 : vector<1x32xf32> to vector<16x32xf32>
    %47 = arith.subf %39, %46 : vector<16x32xf32>
    %48 = arith.mulf %47, %47 : vector<16x32xf32>
    %cst_26 = arith.constant dense<0.000000e+00> : vector<32xf32>
    %49 = vector.multi_reduction <add>, %48, %cst_26 [0] : vector<16x32xf32> to vector<32xf32>
    %50 = vector.shape_cast %49 : vector<32xf32> to vector<1x32xf32>
    %cst_27 = arith.constant 1.600000e+01 : f32
    %51 = vector.broadcast %cst_27 : f32 to vector<1x32xf32>
    %52 = arith.divf %50, %51 : vector<1x32xf32>
    %cst_28 = arith.constant 9.99999974E-6 : f32
    %53 = vector.broadcast %cst_28 : f32 to vector<1x32xf32>
    %54 = arith.addf %52, %53 : vector<1x32xf32>
    %55 = math.rsqrt %54 : vector<1x32xf32>
    %56 = arith.mulf %40, %55 : vector<1x32xf32>
    %57 = vector.broadcast %56 : vector<1x32xf32> to vector<16x32xf32>
    %58 = arith.mulf %47, %57 : vector<16x32xf32>
    %59 = vector.broadcast %41 : vector<1x32xf32> to vector<16x32xf32>
    %60 = arith.addf %58, %59 : vector<16x32xf32>
    %cst_29 = arith.constant 0.000000e+00 : f32
    %61 = vector.broadcast %cst_29 : f32 to vector<16x32xf32>
    %62 = arith.cmpf ogt, %60, %61 : vector<16x32xf32>
    %cst_30 = arith.constant 0.000000e+00 : f32
    %63 = vector.broadcast %cst_30 : f32 to vector<16x32xf32>
    %64 = arith.minimumf %60, %63 : vector<16x32xf32>
    %65 = math.exp %64 : vector<16x32xf32>
    %cst_31 = arith.constant 1.000000e+00 : f32
    %66 = vector.broadcast %cst_31 : f32 to vector<16x32xf32>
    %67 = arith.subf %65, %66 : vector<16x32xf32>
    %68 = arith.select %62, %60, %67 : vector<16x32xi1>, vector<16x32xf32>
    %c0_32 = arith.constant 0 : index
    %c0_33 = arith.constant 0 : index
    %69 = vector.load %arg5[%c0_32, %c0_33] : memref<16x32xf32, #tpu.memory_space<vmem>>, vector<16x32xf32>
    tpu.vector_store %arg5[%c0_32, %c0_33], %68 {strides = array<i32>} : memref<16x32xf32, #tpu.memory_space<vmem>>, vector<16x32xf32>,
    return
  }
}

</mosaic_0001>

<bundles_post_ra>
// kernel: tpu_custom_call.1
= control target key start
LH: loop header
LB: loop body
LE: loop exit
PB: predicated region body
PF: predicated region fallthrough
CT: control target
= control target key end

     0   :  { %vm36_vm0 = vcmask 523264   ;;  %s667_s0 = inlined_call_operand.vmem [shape: f32[16,64], index: 0, kind: input, shape index: {}]   ;;  %s668_s1 = inlined_call_operand.vmem [shape: f32[64,128], index: 1, kind: input, shape index: {}]   ;;  %s669_s2 = inlined_call_operand.vmem [shape: f32[3,128], index: 2, kind: input, shape index: {}]   ;;  %s670_s3 = inlined_call_operand.vmem [shape: f32[128,32], index: 3, kind: input, shape index: {}]   ;;  %s671_s4 = inlined_call_operand.vmem [shape: f32[3,32], index: 4, kind: input, shape index: {}]   ;;  %s672_s5 = inlined_call_operand.hbm [shape: f32[16,32], index: 5, kind: output, shape index: {}]  }
   0x1   :  { %v23_v0 = vld [vmem:[%s668_s1] sm:$0xff]  ;;  %v24_v1 = vld [vmem:[%s668_s1 + $0x8] sm:$0xff]  ;;  %v25_v2 = vld [vmem:[%s668_s1 + $0x10] sm:$0xff] }
   0x2   :  { %v428_v3 = vpack.c.bf16 %v24_v1, %v23_v0  ;;  %v26_v4 = vld [vmem:[%s668_s1 + $0x18] sm:$0xff]  ;;  %v27_v6 = vld [vmem:[%s668_s1 + $0x20] sm:$0xff]  ;;  %v28_v7 = vld [vmem:[%s668_s1 + $0x28] sm:$0xff] }
   0x3   :  { %v432_v5 = vpack.c.bf16 %v26_v4, %v25_v2  ;;  %v21_v8 = vld [vmem:[%s667_s0] sm:$0xff] }
   0x4   :  { %429 = vmatprep.subr.bf16.mxu0 %v428_v3  ;;  %390 = vmatprep.mubr.msk.f32.mxu0 %vm36_vm0, %v21_v8 }
   0x5   :  { %10 = vsyncpa [#allocation3], 0  ;;  %431 = vmatpush3.bf16.msra.mxu0 %v428_v3  ;;  %v436_v9 = vpack.c.bf16 %v28_v7, %v27_v6  ;;  %v29_v10 = vld [vmem:[%s668_s1 + $0x30] sm:$0xff]  ;;  %v30_v11 = vld [vmem:[%s668_s1 + $0x38] sm:$0xff]  ;;  %v144_v0 = vlaneseq  ;;  %vm266_vm3 = vcmask 261120   ;;  %s515_s26 = smov [#allocation2]  }
   0x6   :  { %433 = vmatprep.subr.bf16.mxu0 %v432_v5  ;;  %v440_v12 = vpack.c.bf16 %v30_v11, %v29_v10  ;;  %v22_v13 = vld [vmem:[%s667_s0 + $0x8] sm:$0xff]  ;;  %v168_v14 = vld [vmem:[%s670_s3] sm:$0xff]  ;;  %v170_v17 = vld [vmem:[%s670_s3 + $0x10] sm:$0xff]  ;;  %s325_s27 = sshll.u32 %s515_s26, 4  ;;  %s326_s27 = int_to_ptr.vmem [resolvable:$true] %s325_s27 }
   0x7   :  { %v169_v15 = vld [vmem:[%s670_s3 + $0x8] sm:$0xff]  ;;  %v171_v18 = vld [vmem:[%s670_s3 + $0x18] sm:$0xff]  ;;  %v172_v20 = vld [vmem:[%s670_s3 + $0x20] sm:$0xff]  ;;  %v631_v1 = vshrl.u32 %v144_v0, 7  ;;  %p496_p1 = scmp.lt.s32.totalorder %s326_s27, %s326_s27 }
   0x8   :  { %v444_v16 = vpack.c.bf16 %v169_v15, %v168_v14  ;;  %v448_v19 = vpack.c.bf16 %v171_v18, %v170_v17  ;;  %v173_v21 = vld [vmem:[%s670_s3 + $0x28] sm:$0xff]  ;;  %v174_v23 = vld [vmem:[%s670_s3 + $0x30] sm:$0xff]  ;;  %v175_v24 = vld [vmem:[%s670_s3 + $0x38] sm:$0xff] }
   0x9   :  { %435 = vmatpush3.bf16.msra.mxu0 %v432_v5  ;;  %v452_v22 = vpack.c.bf16 %v173_v21, %v172_v20  ;;  %v176_v25 = vld [vmem:[%s670_s3 + $0x40] sm:$0xff]  ;;  %v456_v26 = vpack.c.bf16 %v175_v24, %v174_v23  ;;  %v177_v27 = vld [vmem:[%s670_s3 + $0x48] sm:$0xff]  ;;  %v178_v29 = vld [vmem:[%s670_s3 + $0x50] sm:$0xff]  ;;  %v146_v3 = vsub.s32 0, %v631_v1 }
   0xa   :  { %437 = vmatprep.subr.bf16.mxu0 %v436_v9  ;;  %445 = vmatprep.subr.bf16.mxu1 %v444_v16  ;;  %v460_v28 = vpack.c.bf16 %v177_v27, %v176_v25  ;;  %v179_v30 = vld [vmem:[%s670_s3 + $0x58] sm:$0xff]  ;;  %v180_v32 = vld [vmem:[%s670_s3 + $0x60] sm:$0xff]  ;;  %v181_v33 = vld [vmem:[%s670_s3 + $0x68] sm:$0xff] }
   0xb   :  { %447 = vmatpush3.bf16.msra.mxu1 %v444_v16  ;;  %v464_v31 = vpack.c.bf16 %v179_v30, %v178_v29  ;;  %v468_v34 = vpack.c.bf16 %v181_v33, %v180_v32  ;;  %v182_v35 = vld [vmem:[%s670_s3 + $0x70] sm:$0xff]  ;;  %v183_v36 = vld [vmem:[%s670_s3 + $0x78] sm:$0xff]  ;;  %v336_v38 = vld [vmem:[%s669_s2] ss:$0 sm:$0xff] }
   0xc   :  { %449 = vmatprep.subr.bf16.mxu1 %v448_v19  ;;  %v472_v37 = vpack.c.bf16 %v183_v36, %v182_v35  ;;  %v118_v2 = vld [vmem:[%s669_s2 + $0x1] sm:$0x1]  ;;  %v339_v7 = vld [vmem:[%s669_s2 + $0x2] ss:$0 sm:$0xff] }
   0xd   :  { %439 = vmatpush3.bf16.msra.mxu0 %v436_v9 }
   0xe   :  { %441 = vmatprep.subr.bf16.mxu0 %v440_v12 }
   0xf   :  { %451 = vmatpush3.bf16.msra.mxu1 %v448_v19 }
  0x10   :  { %453 = vmatprep.subr.bf16.mxu1 %v452_v22 }
  0x11   :  { %443 = vmatpush3.bf16.msra.mxu0 %v440_v12 }
  0x13   :  { %455 = vmatpush3.bf16.msra.mxu1 %v452_v22  ;;  %v342_v22 = vld [vmem:[%s671_s4] ss:$0 sm:$0xff] }
  0x14   :  { %391 = vmatmul.mubr.msk.f32.vlgmr.msra.gmra.mrb[0].mxu0 %vm36_vm0, %v22_v13  ;;  %457 = vmatprep.subr.bf16.mxu1 %v456_v26 }
  0x17   :  { %459 = vmatpush3.bf16.msra.mxu1 %v456_v26 }
  0x18   :  { %461 = vmatprep.subr.bf16.mxu1 %v460_v28 }
  0x1b   :  { %463 = vmatpush3.bf16.msra.mxu1 %v460_v28 }
  0x1c   :  { %465 = vmatprep.subr.bf16.mxu1 %v464_v31 }
  0x1f   :  { %467 = vmatpush3.bf16.msra.mxu1 %v464_v31 }
  0x20   :  { %469 = vmatprep.subr.bf16.mxu1 %v468_v34 }
  0x23   :  { %471 = vmatpush3.bf16.msra.mxu1 %v468_v34 }
  0x24   :  { %473 = vmatprep.subr.bf16.mxu1 %v472_v37 }
  0x27   :  { %475 = vmatpush3.bf16.msra.mxu1 %v472_v37 }
  0xe7   :  { %v392_v39 = vpop.f32.mrb[0].mxu0 }
  0xe8   :  { %v115_v40 = vadd.f32 %v392_v39, %v336_v38  ;;  %v109_v41 = vpop.f32.mrb[1].mxu0 }
  0xe9   :  { %v110_v42 = vadd.f32 %v336_v38, %v109_v41 }
  0xeb   :  { %v120_v43 = vadd.f32 %v115_v40, %v110_v42 }
  0xed   :  { %v121_v44 = vrot.slane %v120_v43, 4 }
  0xef   :  { %v122_v45 = vadd.f32 %v121_v44, %v120_v43 }
  0xf1   :  { %v123_v46 = vrot.slane %v122_v45, 2 }
  0xf3   :  { %v124_v47 = vadd.f32 %v123_v46, %v122_v45 }
  0xf5   :  { %v125_v48 = vrot.slane %v124_v47, 1 }
  0xf7   :  { %v126_v49 = vadd.f32 %v125_v48, %v124_v47 }
  0xf9   :  { %v128_v50 = vmul.f32 0.0625, %v126_v49 }
  0xfb   :  { %v129_v51 = vsub.f32 %v110_v42, %v128_v50  ;;  %v130_v52 = vsub.f32 %v115_v40, %v128_v50 }
  0xfd   :  { %v131_v53 = vmul.f32 %v129_v51, %v129_v51  ;;  %v132_v54 = vmul.f32 %v130_v52, %v130_v52 }
  0xff   :  { %v133_v55 = vadd.f32 %v132_v54, %v131_v53 }
 0x101   :  { %v134_v56 = vrot.slane %v133_v55, 4 }
 0x103   :  { %v135_v57 = vadd.f32 %v134_v56, %v133_v55  ;;  %v343_v56 = vld [vmem:[%s671_s4 + $0x2] ss:$0 sm:$0xff] }
 0x105   :  { %v136_v58 = vrot.slane %v135_v57, 2 }
 0x107   :  { %v137_v59 = vadd.f32 %v136_v58, %v135_v57 }
 0x109   :  { %v138_v60 = vrot.slane %v137_v59, 1 }
 0x10b   :  { %v139_v61 = vadd.f32 %v138_v60, %v137_v59 }
 0x10d   :  { %v140_v62 = vmul.f32 0.0625, %v139_v61 }
 0x10f   :  { %v141_v63 = vadd.f32 1e-05, %v140_v62 }
 0x111   :  { %479 = vrsqrt.f32 %v141_v63 }
 0x11b   :  { %v480_v4 = vpop.eup %479 }
 0x11c   :  { %v143_v5 = vmul.f32 %v480_v4, %v118_v2 }
 0x11e   :  { %v147_v6 = vrot.slane %v143_v5, %v146_v3 }
 0x120   :  { %v148_v8 = vmul.f32 %v147_v6, %v129_v51  ;;  %v149_v9 = vmul.f32 %v147_v6, %v130_v52  ;;  %v264_v52 = vld [vmem:[%s671_s4 + $0x1] sm:$0x1]  ;;  %s491_s4 = scalar_lea.vmem %s326_s27, 256 }
 0x121   :  { %p492_p0 = scmp.ne.s32.totalorder %s326_s27, %s491_s4  ;;  %p497_p2 = scmp.lt.s32.totalorder %s491_s4, %s491_s4 }
 0x122   :  { %v154_v10 = vadd.f32 %v339_v7, %v148_v8  ;;  %v155_v11 = vadd.f32 %v339_v7, %v149_v9 }
 0x123   :  { %p498_p3 = por %p497_p2, %p496_p1 }
 0x124   :  { %v158_v12 = vmin.f32 %v154_v10, 0.0  ;;  %v159_v13 = vmin.f32 %v155_v11, 0.0  ;;  %vm156_vm1 = vcmp.gt.f32.partialorder %v154_v10, 0.0  ;;  %vm157_vm2 = vcmp.gt.f32.partialorder %v155_v11, 0.0 }
 0x125   :  { %p499_p4 = pnand %p498_p3, %p492_p0 }
 0x126   :  { %v160_v14 = vmul.f32 1.442695, %v158_v12  ;;  %v162_v15 = vmul.f32 1.442695, %v159_v13 }
 0x128   :  { %481 = vpow2.f32 %v160_v14 }
 0x129   :  { %483 = vpow2.f32 %v162_v15 }
 0x132   :  { %v482_v16 = vpop.eup %481 }
 0x133   :  { %v484_v17 = vpop.eup %483  ;;  %v340_v18 = vadd.f32 -1.0, %v482_v16 }
 0x134   :  { %v341_v19 = vadd.f32 -1.0, %v484_v17 }
 0x135   :  { %v166_v20 = vsel %vm156_vm1, %v154_v10, %v340_v18 }
 0x136   :  { %425 = vmatprep.mubr.f32.mxu1 %v166_v20  ;;  %v167_v21 = vsel %vm157_vm2, %v155_v11, %v341_v19 }
 0x137   :  { %426 = vmatmul.mubr.f32.vlgmr.msra.gmra.mrb[0].mxu1 %v167_v21 }
 0x20a   :  { %v427_v23 = vpop.f32.mrb[0].mxu1 }
 0x20b   :  { %v261_v24 = vadd.f32 %v427_v23, %v342_v22  ;;  %v255_v25 = vpop.f32.mrb[1].mxu1 }
 0x20c   :  { %v256_v26 = vadd.f32 %v342_v22, %v255_v25 }
 0x20d   :  { %v268_v27 = vsel %vm266_vm3, %v261_v24, 0.0 }
 0x20e   :  { %v267_v28 = vsel %vm266_vm3, %v256_v26, 0.0 }
 0x20f   :  { %v269_v29 = vadd.f32 %v268_v27, %v267_v28 }
 0x211   :  { %v270_v30 = vrot.slane %v269_v29, 4 }
 0x213   :  { %v271_v31 = vadd.f32 %v270_v30, %v269_v29 }
 0x215   :  { %v272_v32 = vrot.slane %v271_v31, 2 }
 0x217   :  { %v273_v33 = vadd.f32 %v272_v32, %v271_v31 }
 0x219   :  { %v274_v34 = vrot.slane %v273_v33, 1 }
 0x21b   :  { %v275_v35 = vadd.f32 %v274_v34, %v273_v33 }
 0x21d   :  { %v276_v36 = vmul.f32 0.0625, %v275_v35 }
 0x21f   :  { %v277_v37 = vsub.f32 %v256_v26, %v276_v36  ;;  %v278_v38 = vsub.f32 %v261_v24, %v276_v36 }
 0x221   :  { %v279_v39 = vmul.f32 %v277_v37, %v277_v37  ;;  %v280_v40 = vmul.f32 %v278_v38, %v278_v38 }
 0x223   :  { %v281_v41 = vsel %vm266_vm3, %v279_v39, 0.0  ;;  %v282_v42 = vsel %vm266_vm3, %v280_v40, 0.0 }
 0x224   :  { %v283_v43 = vadd.f32 %v282_v42, %v281_v41 }
 0x226   :  { %v284_v44 = vrot.slane %v283_v43, 4 }
 0x228   :  { %v285_v45 = vadd.f32 %v284_v44, %v283_v43 }
 0x22a   :  { %v286_v46 = vrot.slane %v285_v45, 2 }
 0x22c   :  { %v287_v47 = vadd.f32 %v286_v46, %v285_v45 }
 0x22e   :  { %v288_v48 = vrot.slane %v287_v47, 1 }
 0x230   :  { %v289_v49 = vadd.f32 %v288_v48, %v287_v47 }
 0x232   :  { %v290_v50 = vmul.f32 0.0625, %v289_v49 }
 0x234   :  { %v291_v51 = vadd.f32 1e-05, %v290_v50 }
 0x236   :  { %485 = vrsqrt.f32 %v291_v51 }
 0x240   :  { %v486_v53 = vpop.eup %485 }
 0x241   :  { %v293_v54 = vmul.f32 %v486_v53, %v264_v52 }
 0x243   :  { %v297_v55 = vrot.slane %v293_v54, %v146_v3 }
 0x245   :  { %v298_v57 = vmul.f32 %v297_v55, %v277_v37  ;;  %v299_v58 = vmul.f32 %v297_v55, %v278_v38 }
 0x247   :  { %v304_v59 = vadd.f32 %v343_v56, %v298_v57  ;;  %v305_v60 = vadd.f32 %v343_v56, %v299_v58 }
 0x249   :  { %v308_v61 = vmin.f32 %v304_v59, 0.0  ;;  %v309_v62 = vmin.f32 %v305_v60, 0.0  ;;  %vm306_vm4 = vcmp.gt.f32.partialorder %v304_v59, 0.0  ;;  %vm307_vm5 = vcmp.gt.f32.partialorder %v305_v60, 0.0 }
 0x24b   :  { %v310_v63 = vmul.f32 1.442695, %v308_v61  ;;  %v312_v0 = vmul.f32 1.442695, %v309_v62 }
 0x24d   :  { %487 = vpow2.f32 %v310_v63 }
 0x24e   :  { %489 = vpow2.f32 %v312_v0 }
 0x257   :  { %v488_v1 = vpop.eup %487 }
 0x258   :  { %v490_v2 = vpop.eup %489  ;;  %v344_v4 = vadd.f32 -1.0, %v488_v1 }
 0x259   :  { %v345_v3 = vadd.f32 -1.0, %v490_v2 }
 0x25a   :  { %v316_v5 = vsel %vm306_vm4, %v304_v59, %v344_v4 }
 0x25b   :  { %v317_v6 = vsel %vm307_vm5, %v305_v60, %v345_v3  ;;  %318 = vst.msk [vmem:[#allocation2] sm:$0xff] %vm266_vm3, %v316_v5 }
 0x25c   :  { %319 = vst.msk [vmem:[#allocation2 + $0x8] sm:$0xff] %vm266_vm3, %v317_v6 }
 0x25d   :  { %502 = shalt.err (!%p499_p4)
}
 0x25e   :  { %s503_s30 = scalar_lea.hbm %s672_s5, 256 }
 0x25f   :  { %p504_p5 = scmp.ne.s32.totalorder %s672_s5, %s503_s30  ;;  %p507_p6 = scmp.lt.u32.totalorder %s503_s30, %s672_s5 }
 0x261   :  { %p509_p7 = pnand %p507_p6, %p504_p5 }
 0x263   :  { %512 = shalt.err (!%p509_p7)
}
 0x264   :  { %s516_s10 = smov 128   ;;  %s517_s11 = smov 8  }
 0x265   :  { %331 = dma.vmem_to_hbm [thread:$0]  %s326_s27, 256, %s672_s5, [#allocation3], %s516_s10, %s516_s10, %s517_s11  }
 0x266   :  { %513 = dma.done.wait [#allocation3], 256  }
 0x267   :  { %514 = vsyncadd [#allocation3], 4294967040 }
 0x268   :  { %335 = vsyncpa [#allocation3], 1 }

</bundles_post_ra>
